<compile_context>
chip_gen: v6e
topology: v6e:2x2x1
jax: 0.10.0
libtpu: 0.0.40
codegen_flags: <defaults>
</compile_context>

<pallas_src>
import numpy as np
import jax
import jax.numpy as jnp
from jax.experimental import pallas as pl
from jax.experimental.pallas import tpu as pltpu


def _upsample_matmul_kernel(x_ref, s_ref, o_ref):
    # x_ref: (BM, L_in)   rows of the flattened input
    # s_ref: (L_in, TN)   0/1 selection matrix (column tile)
    # o_ref: (BM, TN)     rows of the flattened output
    o_ref[...] = jnp.dot(
        x_ref[...], s_ref[...], preferred_element_type=jnp.float32
    ).astype(o_ref.dtype)


def _nearest_indices(in_size, out_size, scale):
    # src = floor(dst / scale), clipped (matches PyTorch for integer scales).
    idx = np.floor(np.arange(out_size) / float(scale)).astype(np.int64)
    return np.minimum(idx, in_size - 1)


def _pick_group(total_in_rows, out_per_row, max_lanes=4096):
    """Smallest divisor G of total_in_rows whose output lane width (G*out_per_row)
    is a multiple of 128 (unmasked stores); else the largest divisor under the cap."""
    best = 1
    for g in range(1, min(total_in_rows, 1024) + 1):
        if total_in_rows % g:
            continue
        lanes = g * out_per_row
        if g > 1 and lanes > max_lanes:
            break
        best = g
        if lanes >= 128 and lanes % 128 == 0:
            return g
    return best


def _pick_row_block(total_rows, l_in, l_out, itemsize):
    """Rows per grid step: fill a few MiB of double-buffered VMEM, keep >=2 row
    blocks when possible (megacore / v7x dual TC), keep blocks sublane-aligned."""
    budget = 8 * 1024 * 1024
    per_row = (l_in + l_out) * itemsize * 2  # double-buffered in + out
    bm = max(1, budget // per_row)
    bm = min(bm, total_rows)
    if total_rows >= 16:
        bm = min(bm, max(8, total_rows // 2))
    if bm < total_rows:
        bm = max(8, (bm // 8) * 8)
        bm = min(bm, total_rows)
    return int(bm)


def upsample_nearest(x, scale_factor):
    """Pallas TPU equivalent of F.interpolate(x, scale_factor=...) (mode='nearest')."""
    N, C, H, W = x.shape
    if isinstance(scale_factor, (tuple, list)):
        sf_h, sf_w = float(scale_factor[0]), float(scale_factor[1])
    else:
        sf_h = sf_w = float(scale_factor)

    OH = int(np.floor(H * sf_h))
    OW = int(np.floor(W * sf_w))

    idx_h = _nearest_indices(H, OH, sf_h)
    idx_w = _nearest_indices(W, OW, sf_w)

    # One-hot selection is exact in the input dtype with f32 accumulation.
    if jnp.issubdtype(x.dtype, jnp.floating):
        compute_dtype = x.dtype
    else:
        compute_dtype = jnp.float32
    itemsize = jnp.dtype(compute_dtype).itemsize

    # ---- choose row grouping -------------------------------------------------
    s_int = OH // H
    uniform_h = (
        s_int >= 1
        and OH == H * s_int
        and np.array_equal(idx_h, np.arange(OH) // s_int)
    )
    if uniform_h:
        # Fast path: each input row expands to exactly s_int consecutive output
        # rows, so groups of G rows may freely cross plane boundaries.
        G = _pick_group(N * C * H, s_int * OW)
        gi, go = G, G * s_int
        row_map = np.arange(go) // s_int
    else:
        # General (fractional-scale) path: one group == one full (H, W) plane.
        # TODO(synk): for fractional scales at very large H*W the kron selection
        # matrix gets big; a dedicated gather kernel would be preferable there.
        gi, go = H, OH
        row_map = idx_h

    l_in, l_out = gi * W, go * OW
    total_rows = (N * C * H) // gi

    # ---- combined selection matrix  S = kron(row_onehot, col_onehot) ----------
    row_onehot = np.zeros((gi, go), dtype=np.float32)
    row_onehot[row_map, np.arange(go)] = 1.0
    col_onehot = np.zeros((W, OW), dtype=np.float32)
    col_onehot[idx_w, np.arange(OW)] = 1.0
    S = jnp.asarray(np.kron(row_onehot, col_onehot), dtype=compute_dtype)

    # ---- tiling ----------------------------------------------------------------
    BM = _pick_row_block(total_rows, l_in, l_out, itemsize)
    if l_out % 128 == 0 and l_out > 2048:
        TN = 2048                      # tile the lane axis so S blocks stay small
    else:
        TN = l_out                     # full (lane-dense when % 128 == 0)
    grid = (pl.cdiv(total_rows, BM), pl.cdiv(l_out, TN))

    x2 = x.reshape(total_rows, l_in).astype(compute_dtype)   # free, contiguous

    out2 = pl.pallas_call(
        _upsample_matmul_kernel,
        out_shape=jax.ShapeDtypeStruct((total_rows, l_out), x.dtype),
        grid_spec=pltpu.PrefetchScalarGridSpec(
            num_scalar_prefetch=0,
            grid=grid,
            in_specs=[
                pl.BlockSpec((BM, l_in), lambda i, j: (i, 0)),
                pl.BlockSpec((l_in, TN), lambda i, j: (0, j)),
            ],
            out_specs=pl.BlockSpec((BM, TN), lambda i, j: (i, j)),
        ),
        compiler_params=pltpu.CompilerParams(
            dimension_semantics=("parallel", "parallel"),
            vmem_limit_bytes=48 * 1024 * 1024,
        ),
    )(x2, S)

    return out2.reshape(N, C, OH, OW)                         # free, contiguous


def _reference_nearest(x, scale_factor):
    # Pure-JAX reference (same nearest index rule).
    N, C, H, W = x.shape
    if isinstance(scale_factor, (tuple, list)):
        sf_h, sf_w = float(scale_factor[0]), float(scale_factor[1])
    else:
        sf_h = sf_w = float(scale_factor)
    OH, OW = int(np.floor(H * sf_h)), int(np.floor(W * sf_w))
    idx_h = jnp.asarray(_nearest_indices(H, OH, sf_h))
    idx_w = jnp.asarray(_nearest_indices(W, OW, sf_w))
    return x[:, :, idx_h, :][:, :, :, idx_w]


if __name__ == "__main__":
    key = jax.random.PRNGKey(0)
    x = jax.random.normal(key, (2, 4, 16, 16), dtype=jnp.float32)
    scale_factor = 2

    y = upsample_nearest(x, scale_factor)
    y = jax.block_until_ready(y)

    y_ref = _reference_nearest(x, scale_factor)
    assert y.shape == (2, 4, 32, 32), y.shape
    assert jnp.allclose(y, y_ref, atol=0.0), "mismatch vs nearest-neighbor reference"

    print("KERNEL_OK")
</pallas_src>

<mosaic_0001>
module attributes {stable_mosaic.version = 11 : i64} {
  func.func @_upsample_matmul_kernel(%arg0: i32, %arg1: i32, %arg2: memref<32x32xf32, #tpu.memory_space<vmem>>, %arg3: memref<32x128xf32, #tpu.memory_space<vmem>>, %arg4: memref<32x128xf32, #tpu.memory_space<vmem>>) attributes {dimension_semantics = [#tpu.dimension_semantics<parallel>, #tpu.dimension_semantics<parallel>], iteration_bounds = array<i64: 2, 1>, scalar_prefetch = 0 : i64, scratch_operands = 0 : i64, tpu.core_type = #tpu.core_type<tc>, window_params = [{transform_indices = @transform_0, window_bounds = array<i64: 32, 32>}, {transform_indices = @transform_1, window_bounds = array<i64: 32, 128>}, {transform_indices = @transform_2, window_bounds = array<i64: 32, 128>}]} {
    %c0 = arith.constant 0 : index
    %c0_0 = arith.constant 0 : index
    %0 = vector.load %arg2[%c0, %c0_0] : memref<32x32xf32, #tpu.memory_space<vmem>>, vector<32x32xf32>
    %c0_1 = arith.constant 0 : index
    %c0_2 = arith.constant 0 : index
    %1 = vector.load %arg3[%c0_1, %c0_2] : memref<32x128xf32, #tpu.memory_space<vmem>>, vector<32x128xf32>
    %cst = arith.constant dense<0.000000e+00> : vector<32x128xf32>
    %2 = tpu.matmul %0, %1, %cst {dimension_numbers = #tpu.dot_dimension_numbers<[1], [0], [0], [1], [0, 0, 1, 1], [], []>} : vector<32x32xf32>, vector<32x128xf32>, vector<32x128xf32> -> vector<32x128xf32>
    %c0_3 = arith.constant 0 : index
    %c0_4 = arith.constant 0 : index
    %3 = vector.load %arg4[%c0_3, %c0_4] : memref<32x128xf32, #tpu.memory_space<vmem>>, vector<32x128xf32>
    tpu.vector_store %arg4[%c0_3, %c0_4], %2 {strides = array<i32>} : memref<32x128xf32, #tpu.memory_space<vmem>>, vector<32x128xf32>,
    return
  }
  func.func @transform_0(%arg0: i32, %arg1: i32) -> (i32, i32) {
    %c0_i32 = arith.constant 0 : i32
    %c0_i32_0 = arith.constant 0 : i32
    return %arg0, %c0_i32 : i32, i32
  }
  func.func @transform_1(%arg0: i32, %arg1: i32) -> (i32, i32) {
    %c0_i32 = arith.constant 0 : i32
    %c0_i32_0 = arith.constant 0 : i32
    return %c0_i32, %arg1 : i32, i32
  }
  func.func @transform_2(%arg0: i32, %arg1: i32) -> (i32, i32) {
    %c0_i32 = arith.constant 0 : i32
    return %arg0, %arg1 : i32, i32
  }
}

</mosaic_0001>

<bundles_post_ra>
// kernel: tpu_custom_call.1
= control target key start
LH: loop header
LB: loop body
LE: loop exit
PB: predicated region body
PF: predicated region fallthrough
CT: control target
= control target key end

     0   :  { %7 = vsyncpa [#allocation3], 0  ;;  %s715_s0 = inlined_call_operand.vmem [shape: f32[64,32], index: 0, kind: input, shape index: {}]   ;;  %s716_s1 = inlined_call_operand.vmem [shape: f32[32,128], index: 1, kind: input, shape index: {}]   ;;  %s717_s2 = inlined_call_operand.hbm [shape: f32[64,128], index: 2, kind: output, shape index: {}]  }
   0x1   :  { %9 = vsyncpa [#allocation3 + $0x1], 0  ;;  %s590_s9 = smov 0   ;;  %s592_s10 = smov 0  }
   0x2   :  { %s594_s11 = smov 0   ;;  %s596_s12 = smov 0  }
   0x3   :  { %s598_s13 = smov 0   ;;  %s600_s14 = smov 0  }
   0x4 LB: > { %s388_s15 = sadd.s32 4294967295, %s570_s14   ;;  %s389_s16 = sadd.s32 4294967294, %s570_s14   ;;  %s570_s14 = sphi %s600_s14, %s15_s14   ;;  %s566_s13 = sphi %s598_s13, %s724_s13   ;;  %s562_s12 = sphi %s596_s12, %s723_s12   ;;  %s558_s11 = sphi %s594_s11, %s722_s11   ;;  %s554_s10 = sphi %s592_s10, %s721_s10   ;;  %s550_s9 = sphi %s590_s9, %s720_s9  }
   0x5   : > { %s27_s17 = sadd.s32 1, %s566_s13  ;;  %s88_s18 = sadd.s32 1, %s558_s11 }
   0x6   : > { %p29_p0 = scmp.ge.s32.totalorder %s27_s17, 2  ;;  %p98_p1 = scmp.ne.s32.totalorder %s558_s11, %s554_s10 }
   0x7   : > { %p99_p2 = scmp.eq.s32.totalorder %s388_s15, 1  ;;  %p104_p3 = scmp.ne.s32.totalorder %s554_s10, %s550_s9 }
   0x8   : > { %s726_s17 = smov (%p29_p0, %s27_s17), 0  ;;  %p105_p5 = scmp.eq.s32.totalorder %s389_s16, 1 }
   0x9   : > { %p630_p4 = por %p99_p2, %p98_p1  ;;  %s83_s20 = ssub.s32 %s566_s13, %s726_s17 }
   0xa   : > { %p393_p6 = scmp.ge.s32.totalorder %s570_s14, 1  ;;  %p86_p7 = scmp.eq.s32.totalorder %s83_s20, 0 }
   0xb   : > { %p637_p8 = por %p105_p5, %p104_p3  ;;  %p139_p9 = scmp.lt.s32.totalorder %s570_s14, 3 }
   0xc   : > { %s643_s22 = scalar_select %p86_p7, %s558_s11, %s88_s18  }
   0xd   : > { %p140_p10 = pnand %p393_p6, %p139_p9 }
   0xe   : > { %s395_s27 = sshll.u32 (!%p140_p10), %s562_s12, 2  ;;  %s162_s8 = sand.u32 (!%p140_p10), 1, %s554_s10  }
   0xf   : > { %143 = sbr.rel (%p140_p10) target bundleno = 239 (0xef), region = 28  ;;  %p166_p11 = scmp.lt.s32.totalorder (!%p140_p10), %s395_s27, 7 }
  0x10   : > { %s394_s15 = sshll.u32 (!%p140_p10), %s162_s8, 5  ;;  %s406_s20 = sshll.u32 (!%p140_p10), %s562_s12, 9 }
  0x11   : > { %s164_s16 = scalar_lea.vmem (!%p140_p10), [#allocation2], %s394_s15  ;;  %s668_s25 = scalar_lea.hbm (!%p140_p10), %s717_s2, %s406_s20 }
  0x12   : > { %s301_s18 = sshll.u32 (!%p140_p10), %s164_s16, 4  ;;  %s670_s26 = scalar_lea.sflag (!%p140_p10), [#allocation3], %s162_s8  ;;  %s663_s18 = int_to_ptr.vmem [resolvable:$true] %s301_s18 }
  0x13   : > { %s494_s12 = scalar_lea.vmem (!%p140_p10), %s663_s18, 512 }
  0x14   : > { %v183_v0 = vld [vmem:[%s716_s1 + $0x18] sm:$0xff]  ;;  %v182_v1 = vld [vmem:[%s716_s1 + $0x10] sm:$0xff]  ;;  %v181_v2 = vld [vmem:[%s716_s1 + $0x8] sm:$0xff]  ;;  %s728_s27 = smov (!%p166_p11, %s395_s27), 7  ;;  %vm184_vm0 = vcmask 261120   ;;  %p495_p12 = scmp.ne.s32.totalorder %s663_s18, %s494_s12 }
  0x15   : > { %415 = vmatprep.subr.mxu0 %v183_v0  ;;  %429 = vmatprep.subr.mxu1 %v183_v0  ;;  %v180_v3 = vld [vmem:[%s716_s1] sm:$0xff]  ;;  %s396_s4 = sshll.u32 %s728_s27, 3  ;;  %s572_s27 = smov [#allocation2]  }
  0x16   : > { %416 = vmatpush3.msra.mxu0 %v183_v0  ;;  %433 = vmatpush3.msra.mxu1 %v183_v0  ;;  %s169_s7 = scalar_lea.vmem %s715_s0, %s396_s4  ;;  %p496_p13 = pnand %p495_p12, %p630_p4 }
  0x17   : > { %417 = vmatprep.subr.mxu0 %v182_v1  ;;  %430 = vmatprep.subr.mxu1 %v182_v1  ;;  %v176_v4 = vld [vmem:[%s169_s7] sm:$0xff]  ;;  %v178_v5 = vld [vmem:[%s169_s7 + $0x10] sm:$0xff]  ;;  %v177_v6 = vld [vmem:[%s169_s7 + $0x8] sm:$0xff]  ;;  %s498_s28 = sshll.u32 %s572_s27, 4  ;;  %s499_s28 = int_to_ptr.vmem [resolvable:$false] %s498_s28 }
  0x18   : > { %418 = vmatpush3.msra.mxu0 %v182_v1  ;;  %434 = vmatpush3.msra.mxu1 %v182_v1  ;;  %v179_v7 = vld [vmem:[%s169_s7 + $0x18] sm:$0xff]  ;;  %p497_p0 = pneg %p496_p13  ;;  %s500_s29 = scalar_lea.vmem %s499_s28, 1024 }
  0x19   : > { %419 = vmatprep.subr.mxu0 %v181_v2  ;;  %431 = vmatprep.subr.mxu1 %v181_v2  ;;  %p501_p1 = scmp.lt.s32.totalorder %s663_s18, %s499_s28  ;;  %p502_p2 = scmp.lt.s32.totalorder %s500_s29, %s494_s12 }
  0x1a   : > { %420 = vmatpush3.msra.mxu0 %v181_v2  ;;  %435 = vmatpush3.msra.mxu1 %v181_v2 }
  0x1b   : > { %421 = vmatprep.subr.mxu0 %v180_v3  ;;  %432 = vmatprep.subr.mxu1 %v180_v3  ;;  %p503_p3 = por %p502_p2, %p501_p1 }
  0x1c   : > { %422 = vmatpush3.msra.mxu0 %v180_v3  ;;  %436 = vmatpush3.msra.mxu1 %v180_v3 }
  0x1d   : > { %423 = vmatprep.mubr.msk.f32.mxu0 %vm184_vm0, %v176_v4  ;;  %426 = vmatprep.mubr.msk.f32.mxu1 %vm184_vm0, %v178_v5  ;;  %p504_p5 = pnand %p503_p3, %p497_p0 }
  0x1e   : > { %424 = vmatmul.mubr.msk.f32.vlgmr.msra.gmra.mxu0 %vm184_vm0, %v177_v6  ;;  %427 = vmatmul.mubr.msk.f32.vlgmr.msra.gmra.mxu1 %vm184_vm0, %v179_v7 }
  0xde   : > { %v425_v8 = vpop.f32.mrf.mxu0  ;;  %v428_v9 = vpop.f32.mrf.mxu1 }
  0xdf   : > { %283 = vst [vmem:[%s164_s16 + $0x8] sm:$0xff] %v425_v8  ;;  %285 = vst [vmem:[%s164_s16 + $0x18] sm:$0xff] %v428_v9 }
  0xe0   : > { %v263_v10 = vpop.f32.mrf.mxu0  ;;  %v273_v11 = vpop.f32.mrf.mxu1 }
  0xe1   : > { %282 = vst [vmem:[%s164_s16] sm:$0xff] %v263_v10  ;;  %284 = vst [vmem:[%s164_s16 + $0x10] sm:$0xff] %v273_v11 }
  0xe2   : > { %507 = shalt.err (!%p504_p5)
}
  0xe3   : > { %s508_s30 = scalar_lea.hbm %s668_s25, 512  ;;  %s512_s5 = scalar_lea.hbm %s717_s2, 1024 }
  0xe4   : > { %p509_p6 = scmp.ne.s32.totalorder %s668_s25, %s508_s30  ;;  %p513_p10 = scmp.lt.s32.totalorder %s668_s25, %s717_s2 }
  0xe5   : > { %p514_p11 = scmp.lt.s32.totalorder %s512_s5, %s508_s30 }
  0xe6   : > { %p510_p7 = pnand %p509_p6, %p630_p4 }
  0xe7   : > { %p515_p12 = por %p514_p11, %p513_p10 }
  0xe8   : > { %p511_p9 = pneg %p510_p7 }
  0xea   : > { %p516_p13 = pnand %p515_p12, %p511_p9 }
  0xec   : > { %519 = shalt.err (!%p516_p13)
}
  0xed   : > { %s573_s8 = smov 128   ;;  %s574_s15 = smov 8  }
  0xee   : > { %437 = dma.vmem_to_hbm [thread:$0]  (%p630_p4), %s663_s18, 512, %s668_s25, %s670_s26, %s573_s8, %s573_s8, %s574_s15  }
  0xef PF: > { %p443_p0 = scmp.ge.s32.totalorder %s570_s14, 2  ;;  %s316_s16 = sand.u32 1, %s550_s9  }
  0xf0   : > { %s317_s20 = scalar_lea.sflag [#allocation3], %s316_s16 }
  0xf1   : > { %p440_p1 = pnand %p443_p0, %p637_p8 }
  0xf3   : > { %p441_p2 = pneg %p440_p1 }
  0xf5   : > { %545 = dma.done.wait (%p441_p2), %s317_s20, 512  }
  0xf6   : > { %547 = vsyncadd (%p441_p2), %s317_s20, 4294966784  ;;  %s15_s14 = sadd.s32 1, %s570_s14   ;;  %s720_s9 = smov %s554_s10 }
  0xf7   : > { %p12_p3 = scmp.ge.s32.totalorder %s15_s14, 4   ;;  %s721_s10 = smov %s558_s11 }
  0xf8   : > { %s722_s11 = smov %s643_s22  ;;  %s723_s12 = smov %s566_s13 }
  0xf9   : > { %s724_s13 = smov %s726_s17  ;;  %14 = sbr.rel (!%p12_p3) target bundleno = 4 (0x4), region = 66 }
  0xfe   :  { %322 = vsyncpa [#allocation3], 1 }
  0xff   :  { %324 = vsyncpa [#allocation3 + $0x1], 1 }

</bundles_post_ra>
